<compile_context>
chip_gen: v7x
topology: tpu7x:2x2x1
jax: 0.10.0
libtpu: 0.0.40
codegen_flags: <defaults>
</compile_context>

<pallas_src>
import jax
import jax.numpy as jnp
from jax.experimental import pallas as pl
from jax.experimental.pallas import tpu as pltpu


def _lora_linear_kernel(x_ref, wt_ref, xa_ref, bt_ref, o_ref, acc_ref):
    k = pl.program_id(2)

    @pl.when(k == 0)
    def _init():
        # Seed the accumulator with the LoRA contribution.  xa = x @ A^T was
        # computed outside the kernel, so this is one tiny (tm, r) @ (r, tn)
        # matmul per output tile, in the operands' native dtype.
        acc_ref[...] = jnp.dot(xa_ref[...], bt_ref[...],
                               preferred_element_type=jnp.float32)

    # Base path: x @ W^T, accumulated in f32 over the k grid axis.
    acc_ref[...] += jnp.dot(x_ref[...], wt_ref[...],
                            preferred_element_type=jnp.float32)

    @pl.when(k == pl.num_programs(2) - 1)
    def _finalize():
        o_ref[...] = acc_ref[...].astype(o_ref.dtype)


def _round_up(x, m):
    return (x + m - 1) // m * m


def _pad2d(a, rows, cols):
    pr, pc = rows - a.shape[0], cols - a.shape[1]
    if pr == 0 and pc == 0:
        return a
    return jnp.pad(a, ((0, pr), (0, pc)))


def _default_tiles():
    """Per-generation (tm, tn, tk, vmem_limit_bytes)."""
    try:
        kind = jax.devices()[0].device_kind.lower()
    except Exception:  # pragma: no cover
        kind = ""
    if "v7" in kind:
        # v7x: 2x256^2 MXU, 2 TCs, 64 MiB physical VMEM -> ~11 MiB f32 d-buf.
        return 512, 512, 1024, None
    if "v6" in kind:
        # v6e: 128 MiB physical VMEM; wide N halves x HBM re-reads.
        return 512, 1024, 1024, 96 << 20
    # v5e and unknown: ~7 MiB f32 double-buffered fits the 16 MiB default
    # scoped VMEM; tn=512 is still fully dense on the 128-wide MXU.
    return 512, 512, 512, None


def _sublane(dtype):
    return {1: 32, 2: 16, 4: 8}.get(jnp.dtype(dtype).itemsize, 8)


def prepare_lora_params(weight, A, B, *, tn=None, tk=None):
    """One-time layout plumbing: transpose/pad the weight-side operands.

    In production these live alongside the parameters so the per-call path
    never re-reads and re-writes the full weight matrix in HBM.
    """
    out_features, in_features = weight.shape
    r = A.shape[0]
    d_tm, d_tn, d_tk, vmem_limit = _default_tiles()
    tn = tn or min(d_tn, _round_up(out_features, 128))
    tk = tk or min(d_tk, _round_up(in_features, 128))
    Np = _round_up(out_features, tn)
    Kp = _round_up(in_features, tk)
    return dict(
        wt=_pad2d(weight.T, Kp, Np),      # [Kp, Np]
        at=A.T,                           # [in, r]  (wrapper-side x @ A^T)
        bt=_pad2d(B.T, r, Np),            # [r,  Np]
        in_features=in_features, out_features=out_features, r=r,
        tn=tn, tk=tk, Np=Np, Kp=Kp,
        d_tm=d_tm, vmem_limit=vmem_limit,
    )


def lora_linear_apply(x, params, *, tm=None):
    in_features = params["in_features"]
    out_features = params["out_features"]
    r = params["r"]
    tn, tk = params["tn"], params["tk"]
    Np, Kp = params["Np"], params["Kp"]

    lead_shape = x.shape[:-1]
    x2d = x.reshape(-1, in_features)
    M = x2d.shape[0]

    tm = tm or min(params["d_tm"], _round_up(max(M, 1), _sublane(x2d.dtype)))
    Mp = _round_up(M, tm)
    grid_m = Mp // tm

    # Megacore: with a single i tile, split N so that at least two j tiles
    # exist (v7x has 2 TensorCores).  Any multiple of 128 dividing Np keeps
    # the prepared padding valid.
    tn_eff = tn
    if grid_m == 1 and Np // tn == 1 and Np >= 256:
        q = Np // 128
        for d in range(2, q + 1):
            if q % d == 0:
                tn_eff = Np // d
                break
    grid_n = Np // tn_eff
    grid_k = Kp // tk

    # LoRA stage-1 outside the kernel: tiny (M x in x r) matmul, f32 for f32
    # models, native dtype otherwise.
    xa_dtype = jnp.float32 if x2d.dtype == jnp.float32 else x2d.dtype
    xa = jnp.dot(x2d, params["at"],
                 preferred_element_type=jnp.float32).astype(xa_dtype)

    xp = _pad2d(x2d, Mp, Kp)       # only x (and xa) are padded per call
    xap = _pad2d(xa, Mp, r)

    # Small-M, deep-K calls are bound on streaming W^T from HBM: use a 3-deep
    # pipeline on that one large operand to hide DMA latency at tile
    # boundaries.
    if M <= tm and grid_k >= 3:
        wt_spec = pl.BlockSpec((tk, tn_eff), lambda i, j, k: (k, j),
                               pipeline_mode=pl.Buffered(3))
    else:
        wt_spec = pl.BlockSpec((tk, tn_eff), lambda i, j, k: (k, j))

    itemsize = jnp.dtype(x2d.dtype).itemsize
    cost = pl.CostEstimate(
        flops=2 * M * in_features * out_features + 2 * M * r * out_features,
        transcendentals=0,
        bytes_accessed=(x2d.size * itemsize
                        + params["wt"].size * jnp.dtype(params["wt"].dtype).itemsize
                        + xa.size * jnp.dtype(xa.dtype).itemsize
                        + params["bt"].size * jnp.dtype(params["bt"].dtype).itemsize
                        + M * out_features * itemsize),
    )

    cp_kwargs = dict(dimension_semantics=("parallel", "parallel", "arbitrary"))
    if params["vmem_limit"] is not None:
        cp_kwargs["vmem_limit_bytes"] = params["vmem_limit"]

    out = pl.pallas_call(
        _lora_linear_kernel,
        out_shape=jax.ShapeDtypeStruct((Mp, Np), x.dtype),
        grid_spec=pltpu.PrefetchScalarGridSpec(
            num_scalar_prefetch=0,
            grid=(grid_m, grid_n, grid_k),
            in_specs=[
                pl.BlockSpec((tm, tk), lambda i, j, k: (i, k)),       # x
                wt_spec,                                              # W^T
                pl.BlockSpec((tm, r), lambda i, j, k: (i, 0)),        # x @ A^T
                pl.BlockSpec((r, tn_eff), lambda i, j, k: (0, j)),    # B^T
            ],
            out_specs=pl.BlockSpec((tm, tn_eff), lambda i, j, k: (i, j)),
            scratch_shapes=[pltpu.VMEM((tm, tn_eff), jnp.float32)],   # f32 acc
        ),
        compiler_params=pltpu.CompilerParams(**cp_kwargs),
        cost_estimate=cost,
    )(xp, params["wt"], xap, params["bt"])

    return out[:M, :out_features].reshape(*lead_shape, out_features)


def lora_linear(x, weight, A, B, *, tm=None, tn=None, tk=None):
    """Convenience wrapper matching LoRALinear.forward.

    x:      [..., in_features]
    weight: [out_features, in_features]
    A:      [r, in_features]
    B:      [out_features, r]
    returns [..., out_features]
    """
    params = prepare_lora_params(weight, A, B, tn=tn, tk=tk)
    return lora_linear_apply(x, params, tm=tm)


if __name__ == "__main__":
    # Small shapes consistent with the module: token vectors [batch, seq, in].
    batch, seq = 2, 8
    in_features, out_features, r = 32, 16, 8

    key = jax.random.PRNGKey(0)
    k_x, k_w, k_a, k_b = jax.random.split(key, 4)

    x = jax.random.normal(k_x, (batch, seq, in_features), dtype=jnp.float32)

    # Parameter init mirroring LoRALinear.__init__:
    #   weight ~ randn(out, in);  A ~ randn(r, in) * 0.01;  B = zeros(out, r)
    weight = jax.random.normal(k_w, (out_features, in_features), dtype=jnp.float32)
    A = jax.random.normal(k_a, (r, in_features), dtype=jnp.float32) * 0.01
    B = jnp.zeros((out_features, r), dtype=jnp.float32)

    y = jax.block_until_ready(lora_linear(x, weight, A, B))
    y_ref = x @ weight.T + x @ (B @ A).T
    assert y.shape == (batch, seq, out_features)
    assert jnp.allclose(y, y_ref, atol=1e-4, rtol=1e-4)

    # Also exercise the LoRA path with a non-zero B (post-training state).
    B2 = jax.random.normal(k_b, (out_features, r), dtype=jnp.float32)
    y2 = jax.block_until_ready(lora_linear(x, weight, A, B2))
    y2_ref = x @ weight.T + x @ (B2 @ A).T
    assert jnp.allclose(y2, y2_ref, atol=1e-4, rtol=1e-4)

    print("KERNEL_OK")
</pallas_src>

<mosaic_0001>
module attributes {stable_mosaic.version = 11 : i64} {
  func.func @_lora_linear_kernel(%arg0: i32, %arg1: i32, %arg2: i32, %arg3: memref<16x128xf32, #tpu.memory_space<vmem>>, %arg4: memref<128x128xf32, #tpu.memory_space<vmem>>, %arg5: memref<16x8xf32, #tpu.memory_space<vmem>>, %arg6: memref<8x128xf32, #tpu.memory_space<vmem>>, %arg7: memref<16x128xf32, #tpu.memory_space<vmem>>, %arg8: memref<16x128xf32, #tpu.memory_space<vmem>>) attributes {dimension_semantics = [#tpu.dimension_semantics<parallel>, #tpu.dimension_semantics<parallel>, #tpu.dimension_semantics<arbitrary>], iteration_bounds = array<i64: 1, 1, 1>, scalar_prefetch = 0 : i64, scratch_operands = 1 : i64, tpu.core_type = #tpu.core_type<tc>, window_params = [{transform_indices = @transform_0, window_bounds = array<i64: 16, 128>}, {transform_indices = @transform_1, window_bounds = array<i64: 128, 128>}, {transform_indices = @transform_2, window_bounds = array<i64: 16, 8>}, {transform_indices = @transform_3, window_bounds = array<i64: 8, 128>}, {transform_indices = @transform_4, window_bounds = array<i64: 16, 128>}]} {
    %c0_i32 = arith.constant 0 : i32
    %0 = arith.cmpi eq, %arg2, %c0_i32 : i32
    %1 = arith.extui %0 : i1 to i32
    %c0_i32_0 = arith.constant 0 : i32
    %2 = arith.cmpi ne, %1, %c0_i32_0 : i32
    scf.if %2 {
      %c0_10 = arith.constant 0 : index
      %c0_11 = arith.constant 0 : index
      %12 = vector.load %arg5[%c0_10, %c0_11] : memref<16x8xf32, #tpu.memory_space<vmem>>, vector<16x8xf32>
      %c0_12 = arith.constant 0 : index
      %c0_13 = arith.constant 0 : index
      %13 = vector.load %arg6[%c0_12, %c0_13] : memref<8x128xf32, #tpu.memory_space<vmem>>, vector<8x128xf32>
      %cst_14 = arith.constant dense<0.000000e+00> : vector<16x128xf32>
      %14 = tpu.matmul %12, %13, %cst_14 {dimension_numbers = #tpu.dot_dimension_numbers<[1], [0], [0], [1], [0, 0, 1, 1], [], []>} : vector<16x8xf32>, vector<8x128xf32>, vector<16x128xf32> -> vector<16x128xf32>
      %c0_15 = arith.constant 0 : index
      %c0_16 = arith.constant 0 : index
      %15 = vector.load %arg8[%c0_15, %c0_16] : memref<16x128xf32, #tpu.memory_space<vmem>>, vector<16x128xf32>
      tpu.vector_store %arg8[%c0_15, %c0_16], %14 {strides = array<i32>} : memref<16x128xf32, #tpu.memory_space<vmem>>, vector<16x128xf32>,
    } else {
    }
    %c0 = arith.constant 0 : index
    %c0_1 = arith.constant 0 : index
    %3 = vector.load %arg8[%c0, %c0_1] : memref<16x128xf32, #tpu.memory_space<vmem>>, vector<16x128xf32>
    %c0_2 = arith.constant 0 : index
    %c0_3 = arith.constant 0 : index
    %4 = vector.load %arg3[%c0_2, %c0_3] : memref<16x128xf32, #tpu.memory_space<vmem>>, vector<16x128xf32>
    %c0_4 = arith.constant 0 : index
    %c0_5 = arith.constant 0 : index
    %5 = vector.load %arg4[%c0_4, %c0_5] : memref<128x128xf32, #tpu.memory_space<vmem>>, vector<128x128xf32>
    %cst = arith.constant dense<0.000000e+00> : vector<16x128xf32>
    %6 = tpu.matmul %4, %5, %cst {dimension_numbers = #tpu.dot_dimension_numbers<[1], [0], [0], [1], [0, 0, 1, 1], [], []>} : vector<16x128xf32>, vector<128x128xf32>, vector<16x128xf32> -> vector<16x128xf32>
    %7 = arith.addf %3, %6 : vector<16x128xf32>
    %c0_6 = arith.constant 0 : index
    %c0_7 = arith.constant 0 : index
    %8 = vector.load %arg8[%c0_6, %c0_7] : memref<16x128xf32, #tpu.memory_space<vmem>>, vector<16x128xf32>
    tpu.vector_store %arg8[%c0_6, %c0_7], %7 {strides = array<i32>} : memref<16x128xf32, #tpu.memory_space<vmem>>, vector<16x128xf32>,
    %c0_i32_8 = arith.constant 0 : i32
    %9 = arith.cmpi eq, %arg2, %c0_i32_8 : i32
    %10 = arith.extui %9 : i1 to i32
    %c0_i32_9 = arith.constant 0 : i32
    %11 = arith.cmpi ne, %10, %c0_i32_9 : i32
    scf.if %11 {
      %c0_10 = arith.constant 0 : index
      %c0_11 = arith.constant 0 : index
      %12 = vector.load %arg8[%c0_10, %c0_11] : memref<16x128xf32, #tpu.memory_space<vmem>>, vector<16x128xf32>
      %c0_12 = arith.constant 0 : index
      %c0_13 = arith.constant 0 : index
      %13 = vector.load %arg7[%c0_12, %c0_13] : memref<16x128xf32, #tpu.memory_space<vmem>>, vector<16x128xf32>
      tpu.vector_store %arg7[%c0_12, %c0_13], %12 {strides = array<i32>} : memref<16x128xf32, #tpu.memory_space<vmem>>, vector<16x128xf32>,
    } else {
    }
    return
  }
  func.func @transform_0(%arg0: i32, %arg1: i32, %arg2: i32) -> (i32, i32) {
    %c0_i32 = arith.constant 0 : i32
    return %arg0, %arg2 : i32, i32
  }
  func.func @transform_1(%arg0: i32, %arg1: i32, %arg2: i32) -> (i32, i32) {
    %c0_i32 = arith.constant 0 : i32
    return %arg2, %arg1 : i32, i32
  }
  func.func @transform_2(%arg0: i32, %arg1: i32, %arg2: i32) -> (i32, i32) {
    %c0_i32 = arith.constant 0 : i32
    %c0_i32_0 = arith.constant 0 : i32
    return %arg0, %c0_i32 : i32, i32
  }
  func.func @transform_3(%arg0: i32, %arg1: i32, %arg2: i32) -> (i32, i32) {
    %c0_i32 = arith.constant 0 : i32
    %c0_i32_0 = arith.constant 0 : i32
    return %c0_i32, %arg1 : i32, i32
  }
  func.func @transform_4(%arg0: i32, %arg1: i32, %arg2: i32) -> (i32, i32) {
    %c0_i32 = arith.constant 0 : i32
    return %arg0, %arg1 : i32, i32
  }
}

</mosaic_0001>

<bundles_post_ra>
// kernel: tpu_custom_call.1
= control target key start
LH: loop header
LB: loop body
LE: loop exit
PB: predicated region body
PF: predicated region fallthrough
CT: control target
= control target key end

     0   :  { %9 = vsyncpa [#allocation4], 0  ;;  %s469_s0 = inlined_call_operand.vmem [shape: f32[16,128], index: 0, kind: input, shape index: {}]   ;;  %s470_s1 = inlined_call_operand.hbm [shape: f32[128,128], index: 1, kind: input, shape index: {}]   ;;  %s471_s2 = inlined_call_operand.vmem [shape: f32[16,8], index: 2, kind: input, shape index: {}]   ;;  %s472_s3 = inlined_call_operand.vmem [shape: f32[8,128], index: 3, kind: input, shape index: {}]   ;;  %s473_s4 = inlined_call_operand.hbm [shape: f32[16,128], index: 4, kind: output, shape index: {}]  }
   0x1   :  { %10 = vsyncpa [#allocation5], 0  ;;  %s395_s15 = smov [#allocation3]   ;;  %s347_s19 = scalar_lea.hbm %s470_s1, 2048 }
   0x2   :  { %s18_s16 = sshll.u32 %s395_s15, 4  ;;  %p348_p0 = scmp.ne.s32.totalorder %s470_s1, %s347_s19  ;;  %s19_s16 = int_to_ptr.vmem [resolvable:$true] %s18_s16 }
   0x3   :  { %p351_p1 = scmp.lt.u32.totalorder %s347_s19, %s470_s1 }
   0x5   :  { %p353_p2 = pnand %p351_p1, %p348_p0 }
   0x7   :  { %356 = shalt.err (!%p353_p2)
}
   0x8   :  { %s357_s24 = scalar_lea.vmem %s19_s16, 2048  ;;  %p362_p4 = scmp.lt.s32.totalorder %s19_s16, %s19_s16 }
   0x9   :  { %p358_p3 = scmp.ne.s32.totalorder %s19_s16, %s357_s24  ;;  %p363_p5 = scmp.lt.s32.totalorder %s357_s24, %s357_s24 }
   0xb   :  { %p364_p6 = por %p363_p5, %p362_p4 }
   0xd   :  { %p365_p7 = pnand %p364_p6, %p358_p3 }
   0xf   :  { %368 = shalt.err (!%p365_p7)
}
  0x10   :  { %s396_s25 = smov 128   ;;  %s397_s26 = smov 8  }
  0x11   :  { %24 = dma.hbm_to_vmem [thread:$0]  %s470_s1, 2048, %s19_s16, [#allocation4], %s396_s25, %s396_s25, %s397_s26  }
  0x12   :  { %391 = dma.done.wait [#allocation4], 2048  }
  0x13   :  { %392 = vsyncadd [#allocation4], 4294965248  ;;  %v127_v0 = vld [vmem:[#allocation3] sm:$0xff]  ;;  %v128_v1 = vld [vmem:[#allocation3 + $0x8] sm:$0xff]  ;;  %vm39_vm0 = vcmask 64512   ;;  %s398_s10 = smov [#allocation6]  }
  0x14   :  { %v129_v2 = vld [vmem:[#allocation3 + $0x10] sm:$0xff]  ;;  %v309_v3 = vpack.c.bf16 %v128_v1, %v127_v0  ;;  %v130_v4 = vld [vmem:[#allocation3 + $0x18] sm:$0xff]  ;;  %v131_v6 = vld [vmem:[#allocation3 + $0x20] sm:$0xff]  ;;  %s234_s11 = sshll.u32 %s398_s10, 4  ;;  %s235_s11 = int_to_ptr.vmem [resolvable:$true] %s234_s11 }
  0x15   :  { %v313_v5 = vpack.c.bf16 %v130_v4, %v129_v2  ;;  %v132_v7 = vld [vmem:[#allocation3 + $0x28] sm:$0xff]  ;;  %v133_v9 = vld [vmem:[#allocation3 + $0x30] sm:$0xff]  ;;  %v38_v10 = vld [vmem:[%s472_s3] sm:$0xff]  ;;  %s369_s12 = scalar_lea.vmem %s235_s11, 256  ;;  %p374_p9 = scmp.lt.s32.totalorder %s235_s11, %s235_s11 }
  0x16   :  { %310 = vmatprep.subr.bf16.mxu0 %v309_v3  ;;  %v317_v8 = vpack.c.bf16 %v132_v7, %v131_v6  ;;  %v36_v11 = vld [vmem:[%s471_s2] sm:$0xff]  ;;  %v134_v12 = vld [vmem:[#allocation3 + $0x38] sm:$0xff]  ;;  %269 = vmatprep.subr.mxu1 %v38_v10  ;;  %v37_v13 = vld [vmem:[%s471_s2 + $0x8] sm:$0xff]  ;;  %p370_p8 = scmp.ne.s32.totalorder %s235_s11, %s369_s12  ;;  %p375_p10 = scmp.lt.s32.totalorder %s369_s12, %s369_s12 }
  0x17   :  { %312 = vmatpush3.bf16.msra.mxu0 %v309_v3  ;;  %271 = vmatprep.mubr.msk.f32.mxu1 %vm39_vm0, %v36_v11  ;;  %v125_v14 = vld [vmem:[%s469_s0] sm:$0xff]  ;;  %v321_v15 = vpack.c.bf16 %v134_v12, %v133_v9  ;;  %v136_v17 = vld [vmem:[#allocation3 + $0x48] sm:$0xff]  ;;  %v137_v19 = vld [vmem:[#allocation3 + $0x50] sm:$0xff] }
  0x18   :  { %314 = vmatprep.subr.bf16.mxu0 %v313_v5  ;;  %270 = vmatpush3.msra.mxu1 %v38_v10  ;;  %v135_v16 = vld [vmem:[#allocation3 + $0x40] sm:$0xff]  ;;  %v138_v20 = vld [vmem:[#allocation3 + $0x58] sm:$0xff]  ;;  %v140_v23 = vld [vmem:[#allocation3 + $0x68] sm:$0xff]  ;;  %p376_p11 = por %p375_p10, %p374_p9 }
  0x19   :  { %306 = vmatprep.mubr.f32.mxu0 %v125_v14  ;;  %272 = vmatmul.mubr.msk.f32.vlgmr.msra.gmra.mrb[0].mxu1 %vm39_vm0, %v37_v13  ;;  %v325_v18 = vpack.c.bf16 %v136_v17, %v135_v16  ;;  %v329_v21 = vpack.c.bf16 %v138_v20, %v137_v19  ;;  %v139_v22 = vld [vmem:[#allocation3 + $0x60] sm:$0xff]  ;;  %v141_v25 = vld [vmem:[#allocation3 + $0x70] sm:$0xff]  ;;  %v142_v26 = vld [vmem:[#allocation3 + $0x78] sm:$0xff] }
  0x1a   :  { %v333_v24 = vpack.c.bf16 %v140_v23, %v139_v22  ;;  %v337_v27 = vpack.c.bf16 %v142_v26, %v141_v25  ;;  %v126_v28 = vld [vmem:[%s469_s0 + $0x8] sm:$0xff]  ;;  %p377_p12 = pnand %p376_p11, %p370_p8 }
  0x1b   :  { %316 = vmatpush3.bf16.msra.mxu0 %v313_v5 }
  0x1c   :  { %318 = vmatprep.subr.bf16.mxu0 %v317_v8 }
  0x1f   :  { %320 = vmatpush3.bf16.msra.mxu0 %v317_v8 }
  0x20   :  { %322 = vmatprep.subr.bf16.mxu0 %v321_v15 }
  0x23   :  { %324 = vmatpush3.bf16.msra.mxu0 %v321_v15 }
  0x24   :  { %326 = vmatprep.subr.bf16.mxu0 %v325_v18 }
  0x27   :  { %328 = vmatpush3.bf16.msra.mxu0 %v325_v18 }
  0x28   :  { %330 = vmatprep.subr.bf16.mxu0 %v329_v21 }
  0x2b   :  { %332 = vmatpush3.bf16.msra.mxu0 %v329_v21 }
  0x2c   :  { %334 = vmatprep.subr.bf16.mxu0 %v333_v24 }
  0x2f   :  { %336 = vmatpush3.bf16.msra.mxu0 %v333_v24 }
  0x30   :  { %338 = vmatprep.subr.bf16.mxu0 %v337_v27 }
  0x33   :  { %340 = vmatpush3.bf16.msra.mxu0 %v337_v27 }
  0x36   :  { %307 = vmatmul.mubr.f32.vlgmr.msra.gmra.mrb[0].mxu0 %v126_v28 }
  0xec   :  { %v273_v29 = vpop.f32.mrb[0].mxu1 }
  0xed   :  { %v112_v30 = vpop.f32.mrb[1].mxu1 }
 0x109   :  { %v308_v31 = vpop.f32.mrb[0].mxu0 }
 0x10a   :  { %v219_v32 = vadd.f32 %v308_v31, %v273_v29  ;;  %v209_v33 = vpop.f32.mrb[1].mxu0 }
 0x10b   :  { %v218_v34 = vadd.f32 %v209_v33, %v112_v30 }
 0x10c   :  { %228 = vst [vmem:[#allocation6 + $0x8] sm:$0xff] %v219_v32 }
 0x10d   :  { %227 = vst [vmem:[#allocation6] sm:$0xff] %v218_v34 }
 0x10e   :  { %380 = shalt.err (!%p377_p12)
}
 0x10f   :  { %s381_s14 = scalar_lea.hbm %s473_s4, 256 }
 0x110   :  { %p382_p13 = scmp.ne.s32.totalorder %s473_s4, %s381_s14  ;;  %p385_p0 = scmp.lt.u32.totalorder %s381_s14, %s473_s4 }
 0x112   :  { %p387_p1 = pnand %p385_p0, %p382_p13 }
 0x114   :  { %390 = shalt.err (!%p387_p1)
}
 0x115   :  { %240 = dma.vmem_to_hbm [thread:$0]  %s235_s11, 256, %s473_s4, [#allocation5], %s396_s25, %s396_s25, %s397_s26  }
 0x116   :  { %393 = dma.done.wait [#allocation5], 256  }
 0x117   :  { %394 = vsyncadd [#allocation5], 4294967040 }
 0x118   :  { %244 = vsyncpa [#allocation4], 1 }
 0x119   :  { %245 = vsyncpa [#allocation5], 1 }

</bundles_post_ra>
